<compile_context>
chip_gen: v6e
topology: v6e:2x2x1
jax: 0.10.0
libtpu: 0.0.40
codegen_flags: <defaults>
</compile_context>

<pallas_src>
import jax
import jax.numpy as jnp
from jax import lax
from jax.experimental import pallas as pl
from jax.experimental.pallas import tpu as pltpu

# ---- model / problem sizes (small, consistent with the module) -------------
D_MODEL = 32
N_HEADS = 4
N_LAYERS = 2
SEQ = 8
BATCH = 2
FFN_HIDDEN = 4 * D_MODEL
EPS = 1e-6


# ---------------------------------------------------------------------------
# in-kernel helpers (elementwise / reduce ops only)
# ---------------------------------------------------------------------------
def _rmsnorm(x, w):
    # x: (R, D), w: (1, D)
    ms = jnp.mean(x * x, axis=-1, keepdims=True)
    return x * lax.rsqrt(ms + EPS) * w


def _erf(x):
    # Abramowitz & Stegun 7.1.26 rational approximation (|err| ~ 1e-7 with an
    # exact divide; the approx reciprocal relaxes that to ~1e-4, fine for
    # inference).  exp and reciprocal both ride the EUP slot.
    a1, a2, a3, a4, a5 = 0.254829592, -0.284496736, 1.421413741, -1.453152027, 1.061405429
    p = 0.3275911
    s = jnp.where(x < 0.0, -1.0, 1.0)
    ax = s * x
    t = pl.reciprocal(1.0 + p * ax, approx=True)
    poly = ((((a5 * t + a4) * t + a3) * t + a2) * t + a1) * t
    return s * (1.0 - poly * jnp.exp(-ax * ax))


def _gelu(x):
    # erf-based GELU (PyTorch nn.GELU default behaviour).
    return 0.5 * x * (1.0 + _erf(x * 0.7071067811865476))


# ---------------------------------------------------------------------------
# fused encoder kernel (single invocation, whole batch)
# ---------------------------------------------------------------------------
def _make_encoder_kernel(n_heads: int, has_bias: bool):
    def kernel(*refs):
        if has_bias:
            q_ref, k_ref, v_ref, bias_ref, wqkv_ref, bq_ref, w32_ref, w128_ref, out_ref = refs
        else:
            q_ref, k_ref, v_ref, wqkv_ref, bq_ref, w32_ref, w128_ref, out_ref = refs
            bias_ref = None

        B, S, D = q_ref.shape
        H = n_heads
        dh = D // H
        F = w128_ref.shape[1]                      # FFN hidden width

        # ---- recover packed parameters (static ref slices -> plain loads) ----
        wqkv = wqkv_ref[...]                       # (3, H, dh, D); q-part pre-scaled
        bq = bq_ref[...]                           # (H, 1, dh);    pre-scaled
        wo = w32_ref[0:D, :]                       # (D, D)
        w2 = w32_ref[D:, :]                        # (F, D)
        w1 = w128_ref[0:D, :]                      # (D, F)
        b1 = w128_ref[D:D + 1, :]                  # (1, F)
        bo = w128_ref[D + 1:D + 2, :D]             # (1, D)  == bo + bv @ wo (host fold)
        n1 = w128_ref[D + 2:D + 3, :D]             # (1, D)
        b2 = w128_ref[D + 3:D + 4, :D]             # (1, D)
        n2 = w128_ref[D + 4:D + 5, :D]             # (1, D)
        fw = w128_ref[D + 5:D + 6, :D]             # (1, D)  final-norm weight

        q_in = q_ref[...]                          # (B, S, D)
        k_in = k_ref[...]
        v_in = v_ref[...]

        # contract D (last dim of both operands), batch on dim 0
        dn_t = (((2,), (2,)), ((0,), (0,)))
        # standard batched matmul
        dn_s = (((2,), (1,)), ((0,), (0,)))

        # ---- fused Q/K/V projection: ONE batched dot, batch = 3*H*B ----------
        qb = jnp.broadcast_to(q_in[None], (H, B, S, D))
        kb = jnp.broadcast_to(k_in[None], (H, B, S, D))
        vb = jnp.broadcast_to(v_in[None], (H, B, S, D))
        x_b = jnp.concatenate([qb, kb, vb], axis=0).reshape(3 * H * B, S, D)
        w_b = jnp.broadcast_to(wqkv.reshape(3 * H, dh, D)[:, None],
                               (3 * H, B, dh, D)).reshape(3 * H * B, dh, D)
        proj = lax.dot_general(x_b, w_b, dn_t,
                               preferred_element_type=jnp.float32)        # (3HB, S, dh)
        proj = proj.reshape(3, H, B, S, dh)
        # bk dropped (softmax-invariant), bv folded into bo on the host.
        qh = (proj[0] + bq[:, None]).reshape(H * B, S, dh)
        kh = proj[1].reshape(H * B, S, dh)
        vh = proj[2].reshape(H * B, S, dh)

        # ---- scaled dot-product attention (scale pre-folded into Wq/bq) ------
        s = lax.dot_general(qh, kh, dn_t,
                            preferred_element_type=jnp.float32)           # (HB, S, S)
        if bias_ref is not None:
            s = (s.reshape(H, B, S, S) + bias_ref[...][None]).reshape(H * B, S, S)
        m = jnp.max(s, axis=-1, keepdims=True)
        e = jnp.exp(s - m)
        p = e * pl.reciprocal(jnp.sum(e, axis=-1, keepdims=True), approx=True)
        ctx = lax.dot_general(p, vh, dn_s,
                              preferred_element_type=jnp.float32)         # (HB, S, dh)

        # ---- output projection: rejoin heads on lanes, single (B*S,D)@(D,D) --
        ctx4 = ctx.reshape(H, B, S, dh)
        ctx_cat = jnp.concatenate([ctx4[h] for h in range(H)], axis=-1)    # (B, S, D)
        ctx2d = ctx_cat.reshape(B * S, D)
        attn = jnp.dot(ctx2d, wo, preferred_element_type=jnp.float32) + bo  # (B*S, D)

        # ---- residual + RMSNorm + FFN on lane-dense (B*S, D) slabs -----------
        q2d = q_in.reshape(B * S, D)
        h1 = _rmsnorm(q2d + attn, n1)
        f = jnp.dot(h1, w1, preferred_element_type=jnp.float32) + b1        # (B*S, F)
        f = _gelu(f)
        f = jnp.dot(f, w2, preferred_element_type=jnp.float32) + b2         # (B*S, D)
        x = _rmsnorm(h1 + f, n2)

        out_ref[...] = _rmsnorm(x, fw).reshape(B, S, D)

    return kernel


# ---------------------------------------------------------------------------
# host-side parameter construction & packing
# ---------------------------------------------------------------------------
def init_params(key, d_model, n_layers, ffn_hidden):
    """Deterministic synthetic weights (shapes match a standard block)."""
    std = 0.02
    layers = []
    for _ in range(n_layers):
        key, *ks = jax.random.split(key, 15)
        nrm = lambda k, shape: std * jax.random.normal(k, shape, jnp.float32)
        layers.append(dict(
            wq=nrm(ks[0], (d_model, d_model)), bq=nrm(ks[1], (1, d_model)),
            wk=nrm(ks[2], (d_model, d_model)), bk=nrm(ks[3], (1, d_model)),
            wv=nrm(ks[4], (d_model, d_model)), bv=nrm(ks[5], (1, d_model)),
            wo=nrm(ks[6], (d_model, d_model)), bo=nrm(ks[7], (1, d_model)),
            w1=nrm(ks[8], (d_model, ffn_hidden)), b1=nrm(ks[9], (1, ffn_hidden)),
            w2=nrm(ks[10], (ffn_hidden, d_model)), b2=nrm(ks[11], (1, d_model)),
            n1=1.0 + nrm(ks[12], (1, d_model)),
            n2=1.0 + nrm(ks[13], (1, d_model)),
        ))
    key, kf = jax.random.split(key)
    final_norm_w = 1.0 + std * jax.random.normal(kf, (1, d_model), jnp.float32)
    return layers, final_norm_w


def pack_params(layers, final_norm_w, d_model, n_heads):
    """Pack the weights the kernel actually needs into 4 lane-friendly arrays.

    Only the LAST layer's weights are packed: the reference forward feeds the
    ORIGINAL query/key/value to every layer and overwrites x, so layers
    0..L-2 never influence the output (dropout is identity at inference).
    Exact folds: 1/sqrt(dh) into Wq/bq, bv into bo (softmax weights sum to 1),
    bk dropped (adds only a per-query constant to the scores).
    """
    D = d_model
    H = n_heads
    dh = D // H
    p = layers[-1]
    scale = 1.0 / float(dh) ** 0.5

    def head_split_t(w, s=1.0):
        # (D_in, D_out) -> (H, dh, D_in): [h, e, d] = s * w[d, h*dh + e]
        return (s * w).reshape(D, H, dh).transpose(1, 2, 0)

    wqkv = jnp.stack([head_split_t(p["wq"], scale),
                      head_split_t(p["wk"]),
                      head_split_t(p["wv"])])                     # (3, H, dh, D)
    bq = (scale * p["bq"]).reshape(H, dh)[:, None, :]              # (H, 1, dh)

    bo_eff = p["bo"] + p["bv"] @ p["wo"]                           # (1, D)  exact bv fold

    # slab 1: trailing dim = D   (wo on top of w2)
    w32 = jnp.concatenate([p["wo"], p["w2"]], axis=0)              # (D + F, D)

    # slab 2: trailing dim = F   (w1, then b1 + all (1, D) vectors as rows)
    F = p["w1"].shape[1]
    tail = jnp.zeros((8, F), jnp.float32)
    tail = tail.at[0, :].set(p["b1"][0])
    tail = tail.at[1, :D].set(bo_eff[0])
    tail = tail.at[2, :D].set(p["n1"][0])
    tail = tail.at[3, :D].set(p["b2"][0])
    tail = tail.at[4, :D].set(p["n2"][0])
    tail = tail.at[5, :D].set(final_norm_w[0])
    w128 = jnp.concatenate([p["w1"], tail], axis=0)                # (D + 8, F)

    return dict(wqkv=wqkv, bq=bq, w32=w32, w128=w128)


def build_attn_bias(attn_mask=None, key_padding_mask=None, batch=None, seq=None):
    """Fold optional masks into an additive (B, S, S) bias; None if no masks."""
    if attn_mask is None and key_padding_mask is None:
        return None   # no bias tensor is built or DMA'd at all
    bias = jnp.zeros((batch, seq, seq), jnp.float32)
    if attn_mask is not None:
        if attn_mask.dtype == jnp.bool_:
            bias = bias + jnp.where(attn_mask[None], -1e9, 0.0)
        else:
            bias = bias + attn_mask[None].astype(jnp.float32)
    if key_padding_mask is not None:
        bias = bias + jnp.where(key_padding_mask[:, None, :], -1e9, 0.0)
    return bias


# ---------------------------------------------------------------------------
# wrapper: one pallas_call, no grid (whole batch in a single invocation)
# ---------------------------------------------------------------------------
def transformer_encoder(query, key, value, packed, attn_bias=None):
    B, S, D = query.shape
    H = packed["wqkv"].shape[1]
    has_bias = attn_bias is not None

    inputs = [query, key, value]
    if has_bias:
        inputs.append(attn_bias)
    inputs += [packed["wqkv"], packed["bq"], packed["w32"], packed["w128"]]

    vmem = pl.BlockSpec(memory_space=pltpu.MemorySpace.VMEM)
    kernel = _make_encoder_kernel(n_heads=int(H), has_bias=has_bias)
    return pl.pallas_call(
        kernel,
        out_shape=jax.ShapeDtypeStruct((B, S, D), jnp.float32),
        in_specs=[vmem] * len(inputs),
        out_specs=vmem,
    )(*inputs)


# ---------------------------------------------------------------------------
if __name__ == "__main__":
    rng = jax.random.PRNGKey(0)
    kq, kk, kv, kp = jax.random.split(rng, 4)

    query = jax.random.normal(kq, (BATCH, SEQ, D_MODEL), jnp.float32)
    key = jax.random.normal(kk, (BATCH, SEQ, D_MODEL), jnp.float32)
    value = jax.random.normal(kv, (BATCH, SEQ, D_MODEL), jnp.float32)

    layers, final_norm_w = init_params(kp, D_MODEL, N_LAYERS, FFN_HIDDEN)
    packed = pack_params(layers, final_norm_w, D_MODEL, N_HEADS)

    # attn_mask=None, key_padding_mask=None -> no bias tensor built or DMA'd
    bias = build_attn_bias(attn_mask=None, key_padding_mask=None,
                           batch=BATCH, seq=SEQ)

    out = jax.jit(transformer_encoder)(query, key, value, packed, bias)
    out = jax.block_until_ready(out)

    assert out.shape == (BATCH, SEQ, D_MODEL)
    assert bool(jnp.all(jnp.isfinite(out)))
    print("KERNEL_OK")
</pallas_src>

<mosaic_0001>
module attributes {stable_mosaic.version = 11 : i64} {
  func.func @kernel(%arg0: memref<2x8x32xf32, #tpu.memory_space<vmem>>, %arg1: memref<2x8x32xf32, #tpu.memory_space<vmem>>, %arg2: memref<2x8x32xf32, #tpu.memory_space<vmem>>, %arg3: memref<3x4x8x32xf32, #tpu.memory_space<vmem>>, %arg4: memref<4x1x8xf32, #tpu.memory_space<vmem>>, %arg5: memref<160x32xf32, #tpu.memory_space<vmem>>, %arg6: memref<40x128xf32, #tpu.memory_space<vmem>>, %arg7: memref<2x8x32xf32, #tpu.memory_space<vmem>>) attributes {dimension_semantics = [], scalar_prefetch = 0 : i64, scratch_operands = 0 : i64, tpu.core_type = #tpu.core_type<tc>} {
    %c0 = arith.constant 0 : index
    %c0_0 = arith.constant 0 : index
    %c0_1 = arith.constant 0 : index
    %c0_2 = arith.constant 0 : index
    %0 = vector.load %arg3[%c0, %c0_0, %c0_1, %c0_2] : memref<3x4x8x32xf32, #tpu.memory_space<vmem>>, vector<3x4x8x32xf32>
    %c0_3 = arith.constant 0 : index
    %c0_4 = arith.constant 0 : index
    %c0_5 = arith.constant 0 : index
    %1 = vector.load %arg4[%c0_3, %c0_4, %c0_5] : memref<4x1x8xf32, #tpu.memory_space<vmem>>, vector<4x1x8xf32>
    %c0_6 = arith.constant 0 : index
    %c0_7 = arith.constant 0 : index
    %2 = vector.load %arg5[%c0_6, %c0_7] : memref<160x32xf32, #tpu.memory_space<vmem>>, vector<32x32xf32>
    %c32 = arith.constant 32 : index
    %c0_8 = arith.constant 0 : index
    %3 = vector.load %arg5[%c32, %c0_8] : memref<160x32xf32, #tpu.memory_space<vmem>>, vector<128x32xf32>
    %c0_9 = arith.constant 0 : index
    %c0_10 = arith.constant 0 : index
    %4 = vector.load %arg6[%c0_9, %c0_10] : memref<40x128xf32, #tpu.memory_space<vmem>>, vector<32x128xf32>
    %c32_11 = arith.constant 32 : index
    %c0_12 = arith.constant 0 : index
    %5 = vector.load %arg6[%c32_11, %c0_12] : memref<40x128xf32, #tpu.memory_space<vmem>>, vector<1x128xf32>
    %c33 = arith.constant 33 : index
    %c0_13 = arith.constant 0 : index
    %6 = vector.load %arg6[%c33, %c0_13] : memref<40x128xf32, #tpu.memory_space<vmem>>, vector<1x32xf32>
    %c34 = arith.constant 34 : index
    %c0_14 = arith.constant 0 : index
    %7 = vector.load %arg6[%c34, %c0_14] : memref<40x128xf32, #tpu.memory_space<vmem>>, vector<1x32xf32>
    %c35 = arith.constant 35 : index
    %c0_15 = arith.constant 0 : index
    %8 = vector.load %arg6[%c35, %c0_15] : memref<40x128xf32, #tpu.memory_space<vmem>>, vector<1x32xf32>
    %c36 = arith.constant 36 : index
    %c0_16 = arith.constant 0 : index
    %9 = vector.load %arg6[%c36, %c0_16] : memref<40x128xf32, #tpu.memory_space<vmem>>, vector<1x32xf32>
    %c37 = arith.constant 37 : index
    %c0_17 = arith.constant 0 : index
    %10 = vector.load %arg6[%c37, %c0_17] : memref<40x128xf32, #tpu.memory_space<vmem>>, vector<1x32xf32>
    %c0_18 = arith.constant 0 : index
    %c0_19 = arith.constant 0 : index
    %c0_20 = arith.constant 0 : index
    %11 = vector.load %arg0[%c0_18, %c0_19, %c0_20] : memref<2x8x32xf32, #tpu.memory_space<vmem>>, vector<2x8x32xf32>
    %c0_21 = arith.constant 0 : index
    %c0_22 = arith.constant 0 : index
    %c0_23 = arith.constant 0 : index
    %12 = vector.load %arg1[%c0_21, %c0_22, %c0_23] : memref<2x8x32xf32, #tpu.memory_space<vmem>>, vector<2x8x32xf32>
    %c0_24 = arith.constant 0 : index
    %c0_25 = arith.constant 0 : index
    %c0_26 = arith.constant 0 : index
    %13 = vector.load %arg2[%c0_24, %c0_25, %c0_26] : memref<2x8x32xf32, #tpu.memory_space<vmem>>, vector<2x8x32xf32>
    %14 = vector.shape_cast %11 : vector<2x8x32xf32> to vector<1x2x8x32xf32>
    %15 = vector.shape_cast %14 : vector<1x2x8x32xf32> to vector<1x2x8x32xf32>
    %16 = vector.broadcast %15 : vector<1x2x8x32xf32> to vector<4x2x8x32xf32>
    %17 = vector.shape_cast %12 : vector<2x8x32xf32> to vector<1x2x8x32xf32>
    %18 = vector.shape_cast %17 : vector<1x2x8x32xf32> to vector<1x2x8x32xf32>
    %19 = vector.broadcast %18 : vector<1x2x8x32xf32> to vector<4x2x8x32xf32>
    %20 = vector.shape_cast %13 : vector<2x8x32xf32> to vector<1x2x8x32xf32>
    %21 = vector.shape_cast %20 : vector<1x2x8x32xf32> to vector<1x2x8x32xf32>
    %22 = vector.broadcast %21 : vector<1x2x8x32xf32> to vector<4x2x8x32xf32>
    %23 = tpu.concatenate %16, %19, %22 in 0 : vector<4x2x8x32xf32>, vector<4x2x8x32xf32>, vector<4x2x8x32xf32> -> vector<12x2x8x32xf32>
    %24 = vector.shape_cast %23 : vector<12x2x8x32xf32> to vector<24x8x32xf32>
    %25 = vector.shape_cast %0 : vector<3x4x8x32xf32> to vector<12x8x32xf32>
    %26 = vector.shape_cast %25 : vector<12x8x32xf32> to vector<12x1x8x32xf32>
    %27 = vector.shape_cast %26 : vector<12x1x8x32xf32> to vector<12x1x8x32xf32>
    %28 = vector.broadcast %27 : vector<12x1x8x32xf32> to vector<12x2x8x32xf32>
    %29 = vector.shape_cast %28 : vector<12x2x8x32xf32> to vector<24x8x32xf32>
    %cst = arith.constant dense<0.000000e+00> : vector<24x8x8xf32>
    %30 = tpu.matmul %24, %29, %cst {dimension_numbers = #tpu.dot_dimension_numbers<[2], [2], [1], [1], [0, 0, 0, 1, 1, 1], [0], [0]>} : vector<24x8x32xf32>, vector<24x8x32xf32>, vector<24x8x8xf32> -> vector<24x8x8xf32>
    %31 = vector.shape_cast %30 : vector<24x8x8xf32> to vector<3x4x2x8x8xf32>
    %32 = vector.extract_strided_slice %31 {offsets = [0, 0, 0, 0, 0], sizes = [1, 4, 2, 8, 8], strides = [1, 1, 1, 1, 1]} : vector<3x4x2x8x8xf32> to vector<1x4x2x8x8xf32>
    %33 = vector.shape_cast %32 : vector<1x4x2x8x8xf32> to vector<4x2x8x8xf32>
    %34 = vector.shape_cast %1 : vector<4x1x8xf32> to vector<4x1x1x8xf32>
    %35 = vector.broadcast %34 : vector<4x1x1x8xf32> to vector<4x2x8x8xf32>
    %36 = arith.addf %33, %35 : vector<4x2x8x8xf32>
    %37 = vector.shape_cast %36 : vector<4x2x8x8xf32> to vector<8x8x8xf32>
    %38 = vector.extract_strided_slice %31 {offsets = [1, 0, 0, 0, 0], sizes = [1, 4, 2, 8, 8], strides = [1, 1, 1, 1, 1]} : vector<3x4x2x8x8xf32> to vector<1x4x2x8x8xf32>
    %39 = vector.shape_cast %38 : vector<1x4x2x8x8xf32> to vector<4x2x8x8xf32>
    %40 = vector.shape_cast %39 : vector<4x2x8x8xf32> to vector<8x8x8xf32>
    %41 = vector.extract_strided_slice %31 {offsets = [2, 0, 0, 0, 0], sizes = [1, 4, 2, 8, 8], strides = [1, 1, 1, 1, 1]} : vector<3x4x2x8x8xf32> to vector<1x4x2x8x8xf32>
    %42 = vector.shape_cast %41 : vector<1x4x2x8x8xf32> to vector<4x2x8x8xf32>
    %43 = vector.shape_cast %42 : vector<4x2x8x8xf32> to vector<8x8x8xf32>
    %cst_27 = arith.constant dense<0.000000e+00> : vector<8x8x8xf32>
    %44 = tpu.matmul %37, %40, %cst_27 {dimension_numbers = #tpu.dot_dimension_numbers<[2], [2], [1], [1], [0, 0, 0, 1, 1, 1], [0], [0]>} : vector<8x8x8xf32>, vector<8x8x8xf32>, vector<8x8x8xf32> -> vector<8x8x8xf32>
    %cst_28 = arith.constant dense<0xFF800000> : vector<8x8xf32>
    %45 = vector.multi_reduction <maximumf>, %44, %cst_28 [2] : vector<8x8x8xf32> to vector<8x8xf32>
    %46 = vector.shape_cast %45 : vector<8x8xf32> to vector<8x8x1xf32>
    %47 = vector.broadcast %46 : vector<8x8x1xf32> to vector<8x8x8xf32>
    %48 = arith.subf %44, %47 : vector<8x8x8xf32>
    %49 = math.exp %48 : vector<8x8x8xf32>
    %cst_29 = arith.constant dense<0.000000e+00> : vector<8x8xf32>
    %50 = vector.multi_reduction <add>, %49, %cst_29 [2] : vector<8x8x8xf32> to vector<8x8xf32>
    %51 = vector.shape_cast %50 : vector<8x8xf32> to vector<8x8x1xf32>
    %52 = tpu.reciprocal %51 {approx = true} : vector<8x8x1xf32> -> vector<8x8x1xf32>
    %53 = vector.broadcast %52 : vector<8x8x1xf32> to vector<8x8x8xf32>
    %54 = arith.mulf %49, %53 : vector<8x8x8xf32>
    %cst_30 = arith.constant dense<0.000000e+00> : vector<8x8x8xf32>
    %55 = tpu.matmul %54, %43, %cst_30 {dimension_numbers = #tpu.dot_dimension_numbers<[2], [1], [1], [2], [0, 0, 0, 1, 1, 2], [0], [0]>} : vector<8x8x8xf32>, vector<8x8x8xf32>, vector<8x8x8xf32> -> vector<8x8x8xf32>
    %56 = vector.shape_cast %55 : vector<8x8x8xf32> to vector<4x2x8x8xf32>
    %57 = vector.extract_strided_slice %56 {offsets = [0, 0, 0, 0], sizes = [1, 2, 8, 8], strides = [1, 1, 1, 1]} : vector<4x2x8x8xf32> to vector<1x2x8x8xf32>
    %58 = vector.shape_cast %57 : vector<1x2x8x8xf32> to vector<2x8x8xf32>
    %59 = vector.extract_strided_slice %56 {offsets = [1, 0, 0, 0], sizes = [1, 2, 8, 8], strides = [1, 1, 1, 1]} : vector<4x2x8x8xf32> to vector<1x2x8x8xf32>
    %60 = vector.shape_cast %59 : vector<1x2x8x8xf32> to vector<2x8x8xf32>
    %61 = vector.extract_strided_slice %56 {offsets = [2, 0, 0, 0], sizes = [1, 2, 8, 8], strides = [1, 1, 1, 1]} : vector<4x2x8x8xf32> to vector<1x2x8x8xf32>
    %62 = vector.shape_cast %61 : vector<1x2x8x8xf32> to vector<2x8x8xf32>
    %63 = vector.extract_strided_slice %56 {offsets = [3, 0, 0, 0], sizes = [1, 2, 8, 8], strides = [1, 1, 1, 1]} : vector<4x2x8x8xf32> to vector<1x2x8x8xf32>
    %64 = vector.shape_cast %63 : vector<1x2x8x8xf32> to vector<2x8x8xf32>
    %65 = tpu.concatenate %58, %60, %62, %64 in 2 : vector<2x8x8xf32>, vector<2x8x8xf32>, vector<2x8x8xf32>, vector<2x8x8xf32> -> vector<2x8x32xf32>
    %66 = vector.shape_cast %65 : vector<2x8x32xf32> to vector<16x32xf32>
    %cst_31 = arith.constant dense<0.000000e+00> : vector<16x32xf32>
    %67 = tpu.matmul %66, %2, %cst_31 {dimension_numbers = #tpu.dot_dimension_numbers<[1], [0], [0], [1], [0, 0, 1, 1], [], []>} : vector<16x32xf32>, vector<32x32xf32>, vector<16x32xf32> -> vector<16x32xf32>
    %68 = vector.broadcast %6 : vector<1x32xf32> to vector<16x32xf32>
    %69 = arith.addf %67, %68 : vector<16x32xf32>
    %70 = vector.shape_cast %11 : vector<2x8x32xf32> to vector<16x32xf32>
    %71 = arith.addf %70, %69 : vector<16x32xf32>
    %72 = arith.mulf %71, %71 : vector<16x32xf32>
    %cst_32 = arith.constant dense<0.000000e+00> : vector<16xf32>
    %73 = vector.multi_reduction <add>, %72, %cst_32 [1] : vector<16x32xf32> to vector<16xf32>
    %74 = vector.shape_cast %73 : vector<16xf32> to vector<16x1xf32>
    %cst_33 = arith.constant 3.200000e+01 : f32
    %75 = vector.broadcast %cst_33 : f32 to vector<16x1xf32>
    %76 = arith.divf %74, %75 : vector<16x1xf32>
    %cst_34 = arith.constant 9.99999997E-7 : f32
    %77 = vector.broadcast %cst_34 : f32 to vector<16x1xf32>
    %78 = arith.addf %76, %77 : vector<16x1xf32>
    %79 = math.rsqrt %78 : vector<16x1xf32>
    %80 = vector.broadcast %79 : vector<16x1xf32> to vector<16x32xf32>
    %81 = arith.mulf %71, %80 : vector<16x32xf32>
    %82 = vector.broadcast %7 : vector<1x32xf32> to vector<16x32xf32>
    %83 = arith.mulf %81, %82 : vector<16x32xf32>
    %cst_35 = arith.constant dense<0.000000e+00> : vector<16x128xf32>
    %84 = tpu.matmul %83, %4, %cst_35 {dimension_numbers = #tpu.dot_dimension_numbers<[1], [0], [0], [1], [0, 0, 1, 1], [], []>} : vector<16x32xf32>, vector<32x128xf32>, vector<16x128xf32> -> vector<16x128xf32>
    %85 = vector.broadcast %5 : vector<1x128xf32> to vector<16x128xf32>
    %86 = arith.addf %84, %85 : vector<16x128xf32>
    %cst_36 = arith.constant 5.000000e-01 : f32
    %87 = vector.broadcast %cst_36 : f32 to vector<16x128xf32>
    %88 = arith.mulf %87, %86 : vector<16x128xf32>
    %cst_37 = arith.constant 0.707106769 : f32
    %89 = vector.broadcast %cst_37 : f32 to vector<16x128xf32>
    %90 = arith.mulf %86, %89 : vector<16x128xf32>
    %cst_38 = arith.constant 0.000000e+00 : f32
    %91 = vector.broadcast %cst_38 : f32 to vector<16x128xf32>
    %92 = arith.cmpf olt, %90, %91 : vector<16x128xf32>
    %cst_39 = arith.constant -1.000000e+00 : f32
    %cst_40 = arith.constant 1.000000e+00 : f32
    %93 = vector.broadcast %cst_39 : f32 to vector<16x128xf32>
    %94 = vector.broadcast %cst_40 : f32 to vector<16x128xf32>
    %95 = arith.select %92, %93, %94 : vector<16x128xi1>, vector<16x128xf32>
    %96 = arith.mulf %95, %90 : vector<16x128xf32>
    %cst_41 = arith.constant 0.327591091 : f32
    %97 = vector.broadcast %cst_41 : f32 to vector<16x128xf32>
    %98 = arith.mulf %97, %96 : vector<16x128xf32>
    %cst_42 = arith.constant 1.000000e+00 : f32
    %99 = vector.broadcast %cst_42 : f32 to vector<16x128xf32>
    %100 = arith.addf %99, %98 : vector<16x128xf32>
    %101 = tpu.reciprocal %100 {approx = true} : vector<16x128xf32> -> vector<16x128xf32>
    %cst_43 = arith.constant 1.06140542 : f32
    %102 = vector.broadcast %cst_43 : f32 to vector<16x128xf32>
    %103 = arith.mulf %102, %101 : vector<16x128xf32>
    %cst_44 = arith.constant -1.45315206 : f32
    %104 = vector.broadcast %cst_44 : f32 to vector<16x128xf32>
    %105 = arith.addf %103, %104 : vector<16x128xf32>
    %106 = arith.mulf %105, %101 : vector<16x128xf32>
    %cst_45 = arith.constant 1.42141378 : f32
    %107 = vector.broadcast %cst_45 : f32 to vector<16x128xf32>
    %108 = arith.addf %106, %107 : vector<16x128xf32>
    %109 = arith.mulf %108, %101 : vector<16x128xf32>
    %cst_46 = arith.constant -0.284496725 : f32
    %110 = vector.broadcast %cst_46 : f32 to vector<16x128xf32>
    %111 = arith.addf %109, %110 : vector<16x128xf32>
    %112 = arith.mulf %111, %101 : vector<16x128xf32>
    %cst_47 = arith.constant 0.254829586 : f32
    %113 = vector.broadcast %cst_47 : f32 to vector<16x128xf32>
    %114 = arith.addf %112, %113 : vector<16x128xf32>
    %115 = arith.mulf %114, %101 : vector<16x128xf32>
    %cst_48 = arith.constant 0.000000e+00 : f32
    %116 = vector.broadcast %cst_48 : f32 to vector<16x128xf32>
    %117 = arith.subf %116, %96 : vector<16x128xf32>
    %118 = arith.mulf %117, %96 : vector<16x128xf32>
    %119 = math.exp %118 : vector<16x128xf32>
    %120 = arith.mulf %115, %119 : vector<16x128xf32>
    %cst_49 = arith.constant 1.000000e+00 : f32
    %121 = vector.broadcast %cst_49 : f32 to vector<16x128xf32>
    %122 = arith.subf %121, %120 : vector<16x128xf32>
    %123 = arith.mulf %95, %122 : vector<16x128xf32>
    %cst_50 = arith.constant 1.000000e+00 : f32
    %124 = vector.broadcast %cst_50 : f32 to vector<16x128xf32>
    %125 = arith.addf %124, %123 : vector<16x128xf32>
    %126 = arith.mulf %88, %125 : vector<16x128xf32>
    %cst_51 = arith.constant dense<0.000000e+00> : vector<16x32xf32>
    %127 = tpu.matmul %126, %3, %cst_51 {dimension_numbers = #tpu.dot_dimension_numbers<[1], [0], [0], [1], [0, 0, 1, 1], [], []>} : vector<16x128xf32>, vector<128x32xf32>, vector<16x32xf32> -> vector<16x32xf32>
    %128 = vector.broadcast %8 : vector<1x32xf32> to vector<16x32xf32>
    %129 = arith.addf %127, %128 : vector<16x32xf32>
    %130 = arith.addf %83, %129 : vector<16x32xf32>
    %131 = arith.mulf %130, %130 : vector<16x32xf32>
    %cst_52 = arith.constant dense<0.000000e+00> : vector<16xf32>
    %132 = vector.multi_reduction <add>, %131, %cst_52 [1] : vector<16x32xf32> to vector<16xf32>
    %133 = vector.shape_cast %132 : vector<16xf32> to vector<16x1xf32>
    %cst_53 = arith.constant 3.200000e+01 : f32
    %134 = vector.broadcast %cst_53 : f32 to vector<16x1xf32>
    %135 = arith.divf %133, %134 : vector<16x1xf32>
    %cst_54 = arith.constant 9.99999997E-7 : f32
    %136 = vector.broadcast %cst_54 : f32 to vector<16x1xf32>
    %137 = arith.addf %135, %136 : vector<16x1xf32>
    %138 = math.rsqrt %137 : vector<16x1xf32>
    %139 = vector.broadcast %138 : vector<16x1xf32> to vector<16x32xf32>
    %140 = arith.mulf %130, %139 : vector<16x32xf32>
    %141 = vector.broadcast %9 : vector<1x32xf32> to vector<16x32xf32>
    %142 = arith.mulf %140, %141 : vector<16x32xf32>
    %143 = arith.mulf %142, %142 : vector<16x32xf32>
    %cst_55 = arith.constant dense<0.000000e+00> : vector<16xf32>
    %144 = vector.multi_reduction <add>, %143, %cst_55 [1] : vector<16x32xf32> to vector<16xf32>
    %145 = vector.shape_cast %144 : vector<16xf32> to vector<16x1xf32>
    %cst_56 = arith.constant 3.200000e+01 : f32
    %146 = vector.broadcast %cst_56 : f32 to vector<16x1xf32>
    %147 = arith.divf %145, %146 : vector<16x1xf32>
    %cst_57 = arith.constant 9.99999997E-7 : f32
    %148 = vector.broadcast %cst_57 : f32 to vector<16x1xf32>
    %149 = arith.addf %147, %148 : vector<16x1xf32>
    %150 = math.rsqrt %149 : vector<16x1xf32>
    %151 = vector.broadcast %150 : vector<16x1xf32> to vector<16x32xf32>
    %152 = arith.mulf %142, %151 : vector<16x32xf32>
    %153 = vector.broadcast %10 : vector<1x32xf32> to vector<16x32xf32>
    %154 = arith.mulf %152, %153 : vector<16x32xf32>
    %155 = vector.shape_cast %154 : vector<16x32xf32> to vector<2x8x32xf32>
    %c0_58 = arith.constant 0 : index
    %c0_59 = arith.constant 0 : index
    %c0_60 = arith.constant 0 : index
    %156 = vector.load %arg7[%c0_58, %c0_59, %c0_60] : memref<2x8x32xf32, #tpu.memory_space<vmem>>, vector<2x8x32xf32>
    tpu.vector_store %arg7[%c0_58, %c0_59, %c0_60], %155 {strides = array<i32>} : memref<2x8x32xf32, #tpu.memory_space<vmem>>, vector<2x8x32xf32>,
    return
  }
}

</mosaic_0001>

<bundles_post_ra>
// kernel: transformer_encoder.1
= control target key start
LH: loop header
LB: loop body
LE: loop exit
PB: predicated region body
PF: predicated region fallthrough
CT: control target
= control target key end

     0   :  { %vm79_vm0 = vcmask 261120   ;;  %v4084_v2 = vmov 0.0   ;;  %vm4085_vm1 = vmmov 0   ;;  %s4556_s0 = inlined_call_operand.vmem [shape: f32[2,8,32], index: 0, kind: input, shape index: {}]   ;;  %s4557_s1 = inlined_call_operand.vmem [shape: f32[2,8,32], index: 1, kind: input, shape index: {}]   ;;  %s4558_s2 = inlined_call_operand.vmem [shape: f32[2,8,32], index: 2, kind: input, shape index: {}]   ;;  %s4559_s3 = inlined_call_operand.vmem [shape: f32[3,4,8,32], index: 3, kind: input, shape index: {}]   ;;  %s4560_s4 = inlined_call_operand.vmem [shape: f32[4,1,8], index: 4, kind: input, shape index: {}]   ;;  %s4561_s5 = inlined_call_operand.vmem [shape: f32[160,32], index: 5, kind: input, shape index: {}]   ;;  %s4562_s6 = inlined_call_operand.vmem [shape: f32[40,128], index: 6, kind: input, shape index: {}]   ;;  %s4563_s7 = inlined_call_operand.hbm [shape: f32[2,8,32], index: 7, kind: output, shape index: {}]  }
   0x1   :  { %v27_v0 = vld [vmem:[%s4559_s3] sm:$0xff]  ;;  %v29_v1 = vld [vmem:[%s4559_s3 + $0x10] sm:$0xff]  ;;  %3745 = vmatprep.subr.mxu1 %v4084_v2  ;;  %3765 = vmatprep.subr.mxu0 %v4084_v2  ;;  %v30_v4 = vld [vmem:[%s4559_s3 + $0x18] sm:$0xff] }
   0x2   :  { %3746 = vmatpush3.xpose.msk.msra.mxu1 %vm79_vm0, %v27_v0  ;;  %3766 = vmatpush3.xpose.msk.msra.mxu0 %vm79_vm0, %v29_v1  ;;  %v4145_v3 = vld [vmem:[%s4556_s0] sm:$0xff] }
   0x3   :  { %3747 = vmatprep.mubr.msk.f32.mxu1 %vm4085_vm1, %v4084_v2  ;;  %3767 = vmatprep.mubr.msk.f32.mxu0 %vm4085_vm1, %v4084_v2 }
   0x4   :  { %3750 = vmatprep.subr.mxu1 %v4084_v2  ;;  %3775 = vmatprep.subr.mxu0 %v4084_v2 }
   0x5   :  { %3748 = vmatmul.mubr.msk.f32.vlgmr.msra.gmra.mxu1 %vm79_vm0, %v4145_v3  ;;  %3768 = vmatmul.mubr.msk.f32.vlgmr.msra.gmra.mxu0 %vm79_vm0, %v4145_v3 }
   0x6   :  { %12 = vsyncpa [#allocation3], 0  ;;  %3751 = vmatpush3.xpose.msk.msra.mxu1 %vm79_vm0, %v27_v0  ;;  %3776 = vmatpush3.xpose.msk.msra.mxu0 %vm79_vm0, %v30_v4  ;;  %v4165_v5 = vld [vmem:[%s4556_s0 + $0x8] sm:$0xff]  ;;  %v31_v7 = vld [vmem:[%s4559_s3 + $0x20] sm:$0xff]  ;;  %vm1846_vm2 = vcmask 64512   ;;  %s4087_s25 = smov 16  }
   0x7   :  { %3752 = vmatprep.mubr.msk.f32.mxu1 %vm4085_vm1, %v4084_v2  ;;  %3777 = vmatprep.mubr.msk.f32.mxu0 %vm4085_vm1, %v4084_v2  ;;  %v28_v6 = vld [vmem:[%s4559_s3 + $0x8] sm:$0xff]  ;;  %v75_v8 = vld [vmem:[%s4557_s1] sm:$0xff]  ;;  %v33_v10 = vld [vmem:[%s4559_s3 + $0x30] sm:$0xff]  ;;  %s4088_s26 = smov 24   ;;  %vm3153_vm3 = vcmask 130048   ;;  %vm3156_vm4 = vcmask 195584  }
   0x8   :  { %3755 = vmatprep.subr.mxu1 %v4084_v2  ;;  %3785 = vmatprep.subr.mxu0 %v4084_v2  ;;  %v32_v9 = vld [vmem:[%s4559_s3 + $0x28] sm:$0xff]  ;;  %v34_v11 = vld [vmem:[%s4559_s3 + $0x38] sm:$0xff]  ;;  %v35_v12 = vld [vmem:[%s4559_s3 + $0x40] sm:$0xff]  ;;  %s4090_s24 = smov [#allocation2]  }
   0x9   :  { %3753 = vmatmul.mubr.msk.f32.vlgmr.msra.gmra.mxu1 %vm79_vm0, %v4165_v5  ;;  %3778 = vmatmul.mubr.msk.f32.vlgmr.msra.gmra.mxu0 %vm79_vm0, %v4145_v3  ;;  %v76_v13 = vld [vmem:[%s4557_s1 + $0x8] sm:$0xff]  ;;  %v77_v14 = vld [vmem:[%s4558_s2] sm:$0xff]  ;;  %v37_v16 = vld [vmem:[%s4559_s3 + $0x50] sm:$0xff] }
   0xa   :  { %3756 = vmatpush3.xpose.msk.msra.mxu1 %vm79_vm0, %v28_v6  ;;  %3786 = vmatpush3.xpose.msk.msra.mxu0 %vm79_vm0, %v31_v7  ;;  %v36_v15 = vld [vmem:[%s4559_s3 + $0x48] sm:$0xff]  ;;  %v38_v17 = vld [vmem:[%s4559_s3 + $0x58] sm:$0xff]  ;;  %v3597_v27 = vld [vmem:[%s4560_s4] ss:$0 sm:$0xff] }
   0xb   :  { %3757 = vmatprep.mubr.msk.f32.mxu1 %vm4085_vm1, %v4084_v2  ;;  %3787 = vmatprep.mubr.msk.f32.mxu0 %vm4085_vm1, %v4084_v2  ;;  %v78_v18 = vld [vmem:[%s4558_s2 + $0x8] sm:$0xff]  ;;  %v3598_v33 = vld [vmem:[%s4560_s4 + $0x1] ss:$0 sm:$0xff]  ;;  %v3599_v39 = vld [vmem:[%s4560_s4 + $0x2] ss:$0 sm:$0xff] }
   0xc   :  { %3760 = vmatprep.subr.mxu1 %v4084_v2  ;;  %3795 = vmatprep.subr.mxu0 %v4084_v2  ;;  %v3600_v45 = vld [vmem:[%s4560_s4 + $0x3] ss:$0 sm:$0xff]  ;;  %s4086_s4 = smov 8  }
   0xd   :  { %3758 = vmatmul.mubr.msk.f32.vlgmr.msra.gmra.mxu1 %vm79_vm0, %v4145_v3  ;;  %3788 = vmatmul.mubr.msk.f32.vlgmr.msra.gmra.mxu0 %vm79_vm0, %v75_v8 }
   0xe   :  { %3761 = vmatpush3.xpose.msk.msra.mxu1 %vm79_vm0, %v28_v6  ;;  %3796 = vmatpush3.xpose.msk.msra.mxu0 %vm79_vm0, %v32_v9 }
   0xf   :  { %3762 = vmatprep.mubr.msk.f32.mxu1 %vm4085_vm1, %v4084_v2  ;;  %3797 = vmatprep.mubr.msk.f32.mxu0 %vm4085_vm1, %v4084_v2 }
  0x10   :  { %3770 = vmatprep.subr.mxu1 %v4084_v2  ;;  %3805 = vmatprep.subr.mxu0 %v4084_v2 }
  0x11   :  { %3763 = vmatmul.mubr.msk.f32.vlgmr.msra.gmra.mxu1 %vm79_vm0, %v4165_v5  ;;  %3798 = vmatmul.mubr.msk.f32.vlgmr.msra.gmra.mxu0 %vm79_vm0, %v75_v8 }
  0x12   :  { %3771 = vmatpush3.xpose.msk.msra.mxu1 %vm79_vm0, %v29_v1  ;;  %3806 = vmatpush3.xpose.msk.msra.mxu0 %vm79_vm0, %v33_v10 }
  0x13   :  { %3772 = vmatprep.mubr.msk.f32.mxu1 %vm4085_vm1, %v4084_v2  ;;  %3807 = vmatprep.mubr.msk.f32.mxu0 %vm4085_vm1, %v4084_v2 }
  0x14   :  { %3780 = vmatprep.subr.mxu1 %v4084_v2  ;;  %3815 = vmatprep.subr.mxu0 %v4084_v2 }
  0x15   :  { %3773 = vmatmul.mubr.msk.f32.vlgmr.msra.gmra.mxu1 %vm79_vm0, %v4165_v5  ;;  %3808 = vmatmul.mubr.msk.f32.vlgmr.msra.gmra.mxu0 %vm79_vm0, %v75_v8 }
  0x16   :  { %3781 = vmatpush3.xpose.msk.msra.mxu1 %vm79_vm0, %v30_v4  ;;  %3816 = vmatpush3.xpose.msk.msra.mxu0 %vm79_vm0, %v34_v11 }
  0x17   :  { %3782 = vmatprep.mubr.msk.f32.mxu1 %vm4085_vm1, %v4084_v2  ;;  %3817 = vmatprep.mubr.msk.f32.mxu0 %vm4085_vm1, %v4084_v2 }
  0x18   :  { %3790 = vmatprep.subr.mxu1 %v4084_v2  ;;  %3825 = vmatprep.subr.mxu0 %v4084_v2 }
  0x19   :  { %3783 = vmatmul.mubr.msk.f32.vlgmr.msra.gmra.mxu1 %vm79_vm0, %v4165_v5  ;;  %3818 = vmatmul.mubr.msk.f32.vlgmr.msra.gmra.mxu0 %vm79_vm0, %v75_v8 }
  0x1a   :  { %3791 = vmatpush3.xpose.msk.msra.mxu1 %vm79_vm0, %v31_v7  ;;  %3792 = vmatprep.mubr.msk.f32.mxu1 %vm4085_vm1, %v4084_v2 }
  0x1b   :  { %3800 = vmatprep.subr.mxu1 %v4084_v2  ;;  %3826 = vmatpush3.xpose.msk.msra.mxu0 %vm79_vm0, %v35_v12 }
  0x1c   :  { %3827 = vmatprep.mubr.msk.f32.mxu0 %vm4085_vm1, %v4084_v2  ;;  %3835 = vmatprep.subr.mxu0 %v4084_v2 }
  0x1d   :  { %3793 = vmatmul.mubr.msk.f32.vlgmr.msra.gmra.mxu1 %vm79_vm0, %v76_v13 }
  0x1e   :  { %3801 = vmatpush3.xpose.msk.msra.mxu1 %vm79_vm0, %v32_v9  ;;  %3802 = vmatprep.mubr.msk.f32.mxu1 %vm4085_vm1, %v4084_v2 }
  0x1f   :  { %3810 = vmatprep.subr.mxu1 %v4084_v2  ;;  %3828 = vmatmul.mubr.msk.f32.vlgmr.msra.gmra.mxu0 %vm79_vm0, %v77_v14 }
  0x20   :  { %3836 = vmatpush3.xpose.msk.msra.mxu0 %vm79_vm0, %v36_v15  ;;  %3837 = vmatprep.mubr.msk.f32.mxu0 %vm4085_vm1, %v4084_v2 }
  0x21   :  { %3803 = vmatmul.mubr.msk.f32.vlgmr.msra.gmra.mxu1 %vm79_vm0, %v76_v13  ;;  %3845 = vmatprep.subr.mxu0 %v4084_v2 }
  0x22   :  { %3811 = vmatpush3.xpose.msk.msra.mxu1 %vm79_vm0, %v33_v10  ;;  %3812 = vmatprep.mubr.msk.f32.mxu1 %vm4085_vm1, %v4084_v2 }
  0x23   :  { %3820 = vmatprep.subr.mxu1 %v4084_v2  ;;  %3838 = vmatmul.mubr.msk.f32.vlgmr.msra.gmra.mxu0 %vm79_vm0, %v77_v14 }
  0x24   :  { %3847 = vmatprep.mubr.msk.f32.mxu0 %vm4085_vm1, %v4084_v2  ;;  %3846 = vmatpush3.xpose.msk.msra.mxu0 %vm79_vm0, %v37_v16 }
  0x25   :  { %3813 = vmatmul.mubr.msk.f32.vlgmr.msra.gmra.mxu1 %vm79_vm0, %v76_v13  ;;  %3855 = vmatprep.subr.mxu0 %v4084_v2 }
  0x26   :  { %3821 = vmatpush3.xpose.msk.msra.mxu1 %vm79_vm0, %v34_v11  ;;  %3822 = vmatprep.mubr.msk.f32.mxu1 %vm4085_vm1, %v4084_v2 }
  0x27   :  { %3830 = vmatprep.subr.mxu1 %v4084_v2  ;;  %3848 = vmatmul.mubr.msk.f32.vlgmr.msra.gmra.mxu0 %vm79_vm0, %v77_v14 }
  0x28   :  { %3856 = vmatpush3.xpose.msk.msra.mxu0 %vm79_vm0, %v38_v17  ;;  %3857 = vmatprep.mubr.msk.f32.mxu0 %vm4085_vm1, %v4084_v2 }
  0x29   :  { %3823 = vmatmul.mubr.msk.f32.vlgmr.msra.gmra.mxu1 %vm79_vm0, %v76_v13  ;;  %3865 = vmatprep.subr.mxu0 %v4084_v2 }
  0x2a   :  { %3831 = vmatpush3.xpose.msk.msra.mxu1 %vm79_vm0, %v35_v12  ;;  %3832 = vmatprep.mubr.msk.f32.mxu1 %vm4085_vm1, %v4084_v2 }
  0x2b   :  { %3840 = vmatprep.subr.mxu1 %v4084_v2  ;;  %3858 = vmatmul.mubr.msk.f32.vlgmr.msra.gmra.mxu0 %vm79_vm0, %v77_v14 }
  0x2c   :  { %3867 = vmatprep.mubr.msk.f32.mxu0 %vm4085_vm1, %v4084_v2 }
  0x2d   :  { %3833 = vmatmul.mubr.msk.f32.vlgmr.msra.gmra.mxu1 %vm79_vm0, %v78_v18 }
  0x2e   :  { %3841 = vmatpush3.xpose.msk.msra.mxu1 %vm79_vm0, %v36_v15  ;;  %3842 = vmatprep.mubr.msk.f32.mxu1 %vm4085_vm1, %v4084_v2 }
  0x2f   :  { %3850 = vmatprep.subr.mxu1 %v4084_v2 }
  0x31   :  { %3843 = vmatmul.mubr.msk.f32.vlgmr.msra.gmra.mxu1 %vm79_vm0, %v78_v18 }
  0x32   :  { %3851 = vmatpush3.xpose.msk.msra.mxu1 %vm79_vm0, %v37_v16  ;;  %3852 = vmatprep.mubr.msk.f32.mxu1 %vm4085_vm1, %v4084_v2 }
  0x33   :  { %3860 = vmatprep.subr.mxu1 %v4084_v2 }
  0x35   :  { %3853 = vmatmul.mubr.msk.f32.vlgmr.msra.gmra.mxu1 %vm79_vm0, %v78_v18 }
  0x36   :  { %3861 = vmatpush3.xpose.msk.msra.mxu1 %vm79_vm0, %v38_v17  ;;  %3862 = vmatprep.mubr.msk.f32.mxu1 %vm4085_vm1, %v4084_v2 }
  0x37   :  { %3870 = vmatprep.subr.mxu1 %v4084_v2 }
  0x39   :  { %3863 = vmatmul.mubr.msk.f32.vlgmr.msra.gmra.mxu1 %vm79_vm0, %v78_v18 }
  0x3a   :  { %3872 = vmatprep.mubr.msk.f32.mxu1 %vm4085_vm1, %v4084_v2 }
  0xc5   :  { %v152_v19 = vpop.f32.mrf.mxu1  ;;  %v441_v20 = vpop.f32.mrf.mxu0 }
  0xc6   :  { %v1838_v30 = vadd.f32 %v3597_v27, %v152_v19  ;;  %v1842_v42 = vadd.f32 %v3599_v39, %v441_v20 }
  0xc7   :  { %v3749_v21 = vpop.f32.mrf.mxu1  ;;  %v3769_v22 = vpop.f32.mrf.mxu0 }
  0xc9   :  { %v225_v23 = vpop.f32.mrf.mxu1  ;;  %v584_v24 = vpop.f32.mrf.mxu0 }
  0xca   :  { %v1844_v48 = vadd.f32 %v3600_v45, %v584_v24  ;;  %v1839_v52 = vadd.f32 %v3597_v27, %v225_v23 }
  0xcb   :  { %v3754_v25 = vpop.f32.mrf.mxu1  ;;  %v3779_v26 = vpop.f32.mrf.mxu0 }
  0xcd   :  { %v298_v28 = vpop.f32.mrf.mxu1  ;;  %v730_v29 = vpop.f32.mrf.mxu0 }
  0xce   :  { %3866 = vmatpush3.xpose.msk.msra.mxu0 %vm1846_vm2, %v730_v29  ;;  %v1840_v36 = vadd.f32 %v3598_v33, %v298_v28 }
  0xcf   :  { %v3759_v31 = vpop.f32.mrf.mxu1  ;;  %v3789_v32 = vpop.f32.mrf.mxu0  ;;  %3875 = vmatprep.subr.mxu0 %v4084_v2 }
  0xd1   :  { %v368_v34 = vpop.f32.mrf.mxu1  ;;  %v876_v35 = vpop.f32.mrf.mxu0  ;;  %3868 = vmatmul.mubr.msk.f32.vlgmr.msra.gmra.mxu0 %vm1846_vm2, %v1838_v30 }
  0xd2   :  { %3876 = vmatpush3.xpose.msk.msra.mxu0 %vm1846_vm2, %v876_v35  ;;  %3877 = vmatprep.mubr.msk.f32.mxu0 %vm4085_vm1, %v4084_v2  ;;  %v1841_v57 = vadd.f32 %v3598_v33, %v368_v34 }
  0xd3   :  { %v3764_v37 = vpop.f32.mrf.mxu1  ;;  %v3799_v38 = vpop.f32.mrf.mxu0  ;;  %3885 = vmatprep.subr.mxu0 %v4084_v2 }
  0xd5   :  { %v511_v40 = vpop.f32.mrf.mxu1  ;;  %v1019_v41 = vpop.f32.mrf.mxu0  ;;  %3878 = vmatmul.mubr.msk.f32.vlgmr.msra.gmra.mxu0 %vm1846_vm2, %v1840_v36 }
  0xd6   :  { %3886 = vmatpush3.xpose.msk.msra.mxu0 %vm1846_vm2, %v1019_v41  ;;  %3887 = vmatprep.mubr.msk.f32.mxu0 %vm4085_vm1, %v4084_v2  ;;  %v1843_v62 = vadd.f32 %v3599_v39, %v511_v40 }
  0xd7   :  { %v3774_v43 = vpop.f32.mrf.mxu1  ;;  %v3809_v44 = vpop.f32.mrf.mxu0  ;;  %3895 = vmatprep.subr.mxu0 %v4084_v2 }
  0xd9   :  { %v654_v46 = vpop.f32.mrf.mxu1  ;;  %v1162_v47 = vpop.f32.mrf.mxu0  ;;  %3888 = vmatmul.mubr.msk.f32.vlgmr.msra.gmra.mxu0 %vm1846_vm2, %v1842_v42 }
  0xda   :  { %3896 = vmatpush3.xpose.msk.msra.mxu0 %vm1846_vm2, %v1162_v47  ;;  %3897 = vmatprep.mubr.msk.f32.mxu0 %vm4085_vm1, %v4084_v2  ;;  %v1845_v1 = vadd.f32 %v3600_v45, %v654_v46 }
  0xdb   :  { %v3784_v49 = vpop.f32.mrf.mxu1  ;;  %v3819_v50 = vpop.f32.mrf.mxu0  ;;  %3905 = vmatprep.subr.mxu0 %v4084_v2 }
  0xdd   :  { %v803_v51 = vpop.f32.mrf.mxu1  ;;  %3898 = vmatmul.mubr.msk.f32.vlgmr.msra.gmra.mxu0 %vm1846_vm2, %v1844_v48 }
  0xde   :  { %3871 = vmatpush3.xpose.msk.msra.mxu1 %vm1846_vm2, %v803_v51  ;;  %3907 = vmatprep.mubr.msk.f32.mxu0 %vm4085_vm1, %v4084_v2 }
  0xdf   :  { %v3794_v53 = vpop.f32.mrf.mxu1  ;;  %3880 = vmatprep.subr.mxu1 %v4084_v2  ;;  %v1308_v54 = vpop.f32.mrf.mxu0 }
  0xe0   :  { %3906 = vmatpush3.msra.mxu0 %v1308_v54 }
  0xe1   :  { %v946_v55 = vpop.f32.mrf.mxu1  ;;  %3873 = vmatmul.mubr.msk.f32.vlgmr.msra.gmra.mxu1 %vm1846_vm2, %v1839_v52  ;;  %v3829_v56 = vpop.f32.mrf.mxu0  ;;  %3915 = vmatprep.subr.mxu0 %v4084_v2 }
  0xe2   :  { %3881 = vmatpush3.xpose.msk.msra.mxu1 %vm1846_vm2, %v946_v55  ;;  %3882 = vmatprep.mubr.msk.f32.mxu1 %vm4085_vm1, %v4084_v2 }
  0xe3   :  { %v3804_v58 = vpop.f32.mrf.mxu1  ;;  %3890 = vmatprep.subr.mxu1 %v4084_v2  ;;  %v4364_v59 = vpop.f32.mrf.mxu0 }
  0xe5   :  { %v1089_v60 = vpop.f32.mrf.mxu1  ;;  %3883 = vmatmul.mubr.msk.f32.vlgmr.msra.gmra.mxu1 %vm1846_vm2, %v1841_v57  ;;  %v3839_v61 = vpop.f32.mrf.mxu0 }
  0xe6   :  { %3891 = vmatpush3.xpose.msk.msra.mxu1 %vm1846_vm2, %v1089_v60  ;;  %3892 = vmatprep.mubr.msk.f32.mxu1 %vm4085_vm1, %v4084_v2 }
  0xe7   :  { %v3814_v63 = vpop.f32.mrf.mxu1  ;;  %3900 = vmatprep.subr.mxu1 %v4084_v2  ;;  %v4379_v6 = vpop.f32.mrf.mxu0 }
  0xe9   :  { %v1232_v0 = vpop.f32.mrf.mxu1  ;;  %3893 = vmatmul.mubr.msk.f32.vlgmr.msra.gmra.mxu1 %vm1846_vm2, %v1843_v62  ;;  %v3849_v7 = vpop.f32.mrf.mxu0 }
  0xea   :  { %3901 = vmatpush3.xpose.msk.msra.mxu1 %vm1846_vm2, %v1232_v0  ;;  %3902 = vmatprep.mubr.msk.f32.mxu1 %vm4085_vm1, %v4084_v2 }
  0xeb   :  { %v3824_v4 = vpop.f32.mrf.mxu1  ;;  %3910 = vmatprep.subr.mxu1 %v4084_v2  ;;  %v4381_v8 = vpop.f32.mrf.mxu0 }
  0xed   :  { %3903 = vmatmul.mubr.msk.f32.vlgmr.msra.gmra.mxu1 %vm1846_vm2, %v1845_v1  ;;  %v3859_v9 = vpop.f32.mrf.mxu0  ;;  %v1381_v10 = vpop.f32.mrf.mxu1 }
  0xee   :  { %3912 = vmatprep.mubr.msk.f32.mxu1 %vm4085_vm1, %v4084_v2  ;;  %3911 = vmatpush3.msra.mxu1 %v1381_v10 }
  0xef   :  { %v3834_v11 = vpop.f32.mrf.mxu1  ;;  %3920 = vmatprep.subr.mxu1 %v4084_v2 }
  0xf1   :  { %v4384_v12 = vpop.f32.mrf.mxu1 }
  0xf3   :  { %v3844_v13 = vpop.f32.mrf.mxu1 }
  0xf5   :  { %v4386_v14 = vpop.f32.mrf.mxu1 }
  0xf7   :  { %v3854_v15 = vpop.f32.mrf.mxu1 }
  0xf9   :  { %v4388_v16 = vpop.f32.mrf.mxu1 }
  0xfb   :  { %v3864_v17 = vpop.f32.mrf.mxu1 }
 0x191   :  { %v1919_v18 = vpop.f32.mrf.mxu0 }
 0x192   :  { %v2455_v19 = vsel %vm1846_vm2, %v1919_v18, -inf }
 0x193   :  { %2456 = vmax.xlane.f32.xlu0 %v2455_v19  ;;  %v3869_v20 = vpop.f32.mrf.mxu0 }
 0x195   :  { %v2071_v21 = vpop.f32.mrf.mxu0 }
 0x196   :  { %v2461_v22 = vsel %vm1846_vm2, %v2071_v21, -inf }
 0x197   :  { %2462 = vmax.xlane.f32.xlu1 %v2461_v22  ;;  %v3879_v23 = vpop.f32.mrf.mxu0 }
 0x199   :  { %v2223_v24 = vpop.f32.mrf.mxu0 }
 0x19a   :  { %v2467_v32 = vsel %vm1846_vm2, %v2223_v24, -inf }
 0x19b   :  { %v3889_v25 = vpop.f32.mrf.mxu0 }
 0x19d   :  { %v2375_v26 = vpop.f32.mrf.mxu0 }
 0x19e   :  { %v2473_v36 = vsel %vm1846_vm2, %v2375_v26, -inf }
 0x19f   :  { %v3899_v27 = vpop.f32.mrf.mxu0 }
 0x1a1   :  { %v1995_v28 = vpop.f32.mrf.mxu1 }
 0x1a2   :  { %v2458_v29 = vsel %vm1846_vm2, %v1995_v28, -inf }
 0x1a3   :  { %2459 = vmax.xlane.f32.xlu0 %v2458_v29  ;;  %v3874_v30 = vpop.f32.mrf.mxu1 }
 0x1a5   :  { %v2147_v31 = vpop.f32.mrf.mxu1 }
 0x1a6   :  { %v2464_v33 = vsel %vm1846_vm2, %v2147_v31, -inf }
 0x1a7   :  { %2468 = vmax.xlane.f32.xlu0 %v2467_v32  ;;  %2465 = vmax.xlane.f32.xlu1 %v2464_v33  ;;  %v3884_v34 = vpop.f32.mrf.mxu1 }
 0x1a9   :  { %v2299_v35 = vpop.f32.mrf.mxu1 }
 0x1aa   :  { %v2470_v37 = vsel %vm1846_vm2, %v2299_v35, -inf }
 0x1ab   :  { %2474 = vmax.xlane.f32.xlu0 %v2473_v36  ;;  %2471 = vmax.xlane.f32.xlu1 %v2470_v37  ;;  %v3894_v38 = vpop.f32.mrf.mxu1 }
 0x1ad   :  { %v2451_v39 = vpop.f32.mrf.mxu1 }
 0x1ae   :  { %v2476_v40 = vsel %vm1846_vm2, %v2451_v39, -inf }
 0x1af   :  { %2477 = vmax.xlane.f32.xlu1 %v2476_v40  ;;  %v3904_v41 = vpop.f32.mrf.mxu1 }
 0x21c   :  { %v2457_v42 = vpop.xlane.xlu0 %2456 }
 0x21d   :  { %v2479_v43 = vsub.f32 %v1919_v18, %v2457_v42 }
 0x21f   :  { %v2487_v44 = vmul.f32 1.442695, %v2479_v43 }
 0x220   :  { %v2463_v45 = vpop.xlane.xlu1 %2462 }
 0x221   :  { %4010 = vpow2.f32 %v2487_v44  ;;  %v2481_v46 = vsub.f32 %v2071_v21, %v2463_v45 }
 0x223   :  { %v2491_v47 = vmul.f32 1.442695, %v2481_v46 }
 0x225   :  { %4012 = vpow2.f32 %v2491_v47 }
 0x22c   :  { %v2460_v48 = vpop.xlane.xlu0 %2459 }
 0x22d   :  { %v2480_v49 = vsub.f32 %v1995_v28, %v2460_v48 }
 0x22e   :  { %v4011_v50 = vpop.eup %4010 }
 0x22f   :  { %v2489_v51 = vmul.f32 1.442695, %v2480_v49  ;;  %v2503_v52 = vsel %vm1846_vm2, %v4011_v50, 0.0 }
 0x230   :  { %2504 = vadd.xlane.f32.xlu0 %v2503_v52  ;;  %v2469_v53 = vpop.xlane.xlu0 %2468  ;;  %v2466_v54 = vpop.xlane.xlu1 %2465  ;;  %v43_v52 = vld [vmem:[%s4561_s5] sm:$0xff] }
 0x231   :  { %4014 = vpow2.f32 %v2489_v51  ;;  %v2483_v55 = vsub.f32 %v2223_v24, %v2469_v53  ;;  %v2482_v56 = vsub.f32 %v2147_v31, %v2466_v54  ;;  %v44_v51 = vld [vmem:[%s4561_s5 + $0x8] sm:$0xff] }
 0x232   :  { %v4013_v57 = vpop.eup %4012 }
 0x233   :  { %v2495_v58 = vmul.f32 1.442695, %v2483_v55  ;;  %v2493_v60 = vmul.f32 1.442695, %v2482_v56  ;;  %v2509_v61 = vsel %vm1846_vm2, %v4013_v57, 0.0 }
 0x234   :  { %2510 = vadd.xlane.f32.xlu0 %v2509_v61  ;;  %v2475_v62 = vpop.xlane.xlu0 %2474  ;;  %v2472_v63 = vpop.xlane.xlu1 %2471 }
 0x235   :  { %4016 = vpow2.f32 %v2495_v58  ;;  %v2485_v0 = vsub.f32 %v2375_v26, %v2475_v62  ;;  %v2484_v1 = vsub.f32 %v2299_v35, %v2472_v63 }
 0x236   :  { %4018 = vpow2.f32 %v2493_v60 }
 0x237   :  { %v2499_v4 = vmul.f32 1.442695, %v2485_v0  ;;  %v2497_v7 = vmul.f32 1.442695, %v2484_v1 }
 0x238   :  { %v2478_v9 = vpop.xlane.xlu1 %2477 }
 0x239   :  { %4020 = vpow2.f32 %v2499_v4  ;;  %v2486_v10 = vsub.f32 %v2451_v39, %v2478_v9 }
 0x23a   :  { %4022 = vpow2.f32 %v2497_v7 }
 0x23b   :  { %v2501_v11 = vmul.f32 1.442695, %v2486_v10 }
 0x23d   :  { %4024 = vpow2.f32 %v2501_v11 }
 0x23e   :  { %v4015_v13 = vpop.eup %4014 }
 0x23f   :  { %v2506_v15 = vsel %vm1846_vm2, %v4015_v13, 0.0 }
 0x240   :  { %2507 = vadd.xlane.f32.xlu1 %v2506_v15 }
 0x242   :  { %v4017_v17 = vpop.eup %4016 }
 0x243   :  { %v4019_v18 = vpop.eup %4018  ;;  %v2515_v19 = vsel %vm1846_vm2, %v4017_v17, 0.0 }
 0x244   :  { %2516 = vadd.xlane.f32.xlu0 %v2515_v19  ;;  %v2512_v20 = vsel %vm1846_vm2, %v4019_v18, 0.0 }
 0x245   :  { %2513 = vadd.xlane.f32.xlu1 %v2512_v20 }
 0x246   :  { %v4021_v21 = vpop.eup %4020 }
 0x247   :  { %v4023_v22 = vpop.eup %4022  ;;  %v2521_v23 = vsel %vm1846_vm2, %v4021_v21, 0.0 }
 0x248   :  { %2522 = vadd.xlane.f32.xlu0 %v2521_v23  ;;  %v2518_v24 = vsel %vm1846_vm2, %v4023_v22, 0.0 }
 0x249   :  { %2519 = vadd.xlane.f32.xlu1 %v2518_v24 }
 0x24a   :  { %v4025_v25 = vpop.eup %4024 }
 0x24b   :  { %v2524_v26 = vsel %vm1846_vm2, %v4025_v25, 0.0 }
 0x24d   :  { %2525 = vadd.xlane.f32.xlu1 %v2524_v26 }
 0x2b9   :  { %v2505_v27 = vpop.xlane.xlu0 %2504 }
 0x2ba   :  { %4026 = vrcp.f32 %v2505_v27 }
 0x2bd   :  { %v2511_v28 = vpop.xlane.xlu0 %2510 }
 0x2be   :  { %4028 = vrcp.f32 %v2511_v28 }
 0x2c7   :  { %v4027_v29 = vpop.eup %4026 }
 0x2c8   :  { %v2535_v30 = vmul.f32 %v4027_v29, %v4011_v50  ;;  %v46_v50 = vld [vmem:[%s4561_s5 + $0x18] sm:$0xff] }
 0x2c9   :  { %v2508_v31 = vpop.xlane.xlu1 %2507 }
 0x2ca   :  { %4030 = vrcp.f32 %v2508_v31  ;;  %3908 = vmatmul.mubr.msk.f32.vlgmr.msra.gmra.mxu0 %vm1846_vm2, %v2535_v30 }
 0x2cb   :  { %v4029_v32 = vpop.eup %4028  ;;  %3916 = vmatpush3.msra.mxu0 %v4364_v59  ;;  %3917 = vmatprep.mubr.msk.f32.mxu0 %vm4085_vm1, %v4084_v2 }
 0x2cc   :  { %3925 = vmatprep.subr.mxu0 %v4084_v2  ;;  %v2537_v33 = vmul.f32 %v4029_v32, %v4013_v57  ;;  %v66_v32 = vld [vmem:[%s4562_s6 + $0x18] sm:$0xff] }
 0x2cd   :  { %v2517_v34 = vpop.xlane.xlu0 %2516 }
 0x2ce   :  { %4032 = vrcp.f32 %v2517_v34  ;;  %v2514_v35 = vpop.xlane.xlu1 %2513  ;;  %3918 = vmatmul.mubr.msk.f32.vlgmr.msra.gmra.mxu0 %vm1846_vm2, %v2537_v33  ;;  %v65_v33 = vld [vmem:[%s4562_s6 + $0x10] sm:$0xff] }
 0x2cf   :  { %4034 = vrcp.f32 %v2514_v35  ;;  %3926 = vmatpush3.msra.mxu0 %v4379_v6  ;;  %3927 = vmatprep.mubr.msk.f32.mxu0 %vm4085_vm1, %v4084_v2 }
 0x2d0   :  { %3935 = vmatprep.subr.mxu0 %v4084_v2 }
 0x2d1   :  { %v2523_v59 = vpop.xlane.xlu0 %2522 }
 0x2d2   :  { %4036 = vrcp.f32 %v2523_v59  ;;  %v2520_v36 = vpop.xlane.xlu1 %2519 }
 0x2d3   :  { %4038 = vrcp.f32 %v2520_v36 }
 0x2d6   :  { %v2526_v37 = vpop.xlane.xlu1 %2525 }
 0x2d7   :  { %v4031_v38 = vpop.eup %4030  ;;  %4040 = vrcp.f32 %v2526_v37 }
 0x2d8   :  { %v2536_v39 = vmul.f32 %v4031_v38, %v4015_v13 }
 0x2da   :  { %3913 = vmatmul.mubr.msk.f32.vlgmr.msra.gmra.mxu1 %vm1846_vm2, %v2536_v39 }
 0x2db   :  { %v4033_v40 = vpop.eup %4032  ;;  %3921 = vmatpush3.msra.mxu1 %v4384_v12  ;;  %3922 = vmatprep.mubr.msk.f32.mxu1 %vm4085_vm1, %v4084_v2 }
 0x2dc   :  { %v4035_v6 = vpop.eup %4034  ;;  %3930 = vmatprep.subr.mxu1 %v4084_v2  ;;  %v2539_v41 = vmul.f32 %v4033_v40, %v4017_v17 }
 0x2dd   :  { %v2538_v42 = vmul.f32 %v4035_v6, %v4019_v18 }
 0x2de   :  { %3928 = vmatmul.mubr.msk.f32.vlgmr.msra.gmra.mxu0 %vm1846_vm2, %v2539_v41  ;;  %v3628_v41 = vld [vmem:[%s4562_s6 + $0x22] ss:$0 sm:$0xff] }
 0x2df   :  { %v4037_v43 = vpop.eup %4036  ;;  %3923 = vmatmul.mubr.msk.f32.vlgmr.msra.gmra.mxu1 %vm1846_vm2, %v2538_v42  ;;  %3936 = vmatpush3.msra.mxu0 %v4381_v8 }
 0x2e0   :  { %v4039_v44 = vpop.eup %4038  ;;  %3931 = vmatpush3.msra.mxu1 %v4386_v14  ;;  %3932 = vmatprep.mubr.msk.f32.mxu1 %vm4085_vm1, %v4084_v2  ;;  %v2541_v12 = vmul.f32 %v4037_v43, %v4021_v21  ;;  %v3625_v21 = vld [vmem:[%s4562_s6 + $0x21] ss:$0 sm:$0xff] }
 0x2e1   :  { %3937 = vmatprep.mubr.msk.f32.mxu0 %vm4085_vm1, %v4084_v2  ;;  %3940 = vmatprep.subr.mxu1 %v4084_v2  ;;  %v2540_v45 = vmul.f32 %v4039_v44, %v4023_v22 }
 0x2e2   :  { %3938 = vmatmul.mubr.msk.f32.vlgmr.msra.gmra.mxu0 %vm1846_vm2, %v2541_v12  ;;  %v62_v12 = vld [vmem:[%s4561_s5 + $0x98] sm:$0xff] }
 0x2e3   :  { %3933 = vmatmul.mubr.msk.f32.vlgmr.msra.gmra.mxu1 %vm1846_vm2, %v2540_v45  ;;  %3967 = vmatprep.subr.mxu0 %v62_v12  ;;  %v61_v45 = vld [vmem:[%s4561_s5 + $0x90] sm:$0xff] }
 0x2e4   :  { %v4041_v46 = vpop.eup %4040  ;;  %3941 = vmatpush3.msra.mxu1 %v4388_v16  ;;  %3942 = vmatprep.mubr.msk.f32.mxu1 %vm4085_vm1, %v4084_v2  ;;  %v45_v16 = vld [vmem:[%s4561_s5 + $0x10] sm:$0xff] }
 0x2e5   :  { %v2542_v8 = vmul.f32 %v4041_v46, %v4025_v25  ;;  %3945 = vmatprep.subr.mxu1 %v46_v50  ;;  %3968 = vmatpush3.msra.mxu0 %v62_v12  ;;  %v60_v46 = vld [vmem:[%s4561_s5 + $0x88] sm:$0xff] }
 0x2e6   :  { %3969 = vmatprep.subr.mxu0 %v61_v45 }
 0x2e7   :  { %3943 = vmatmul.mubr.msk.f32.vlgmr.msra.gmra.mxu1 %vm1846_vm2, %v2542_v8  ;;  %3970 = vmatpush3.msra.mxu0 %v61_v45  ;;  %v59_v8 = vld [vmem:[%s4561_s5 + $0x80] sm:$0xff] }
 0x2e8   :  { %3946 = vmatpush3.msra.mxu1 %v46_v50  ;;  %3971 = vmatprep.subr.mxu0 %v60_v46  ;;  %v54_v50 = vld [vmem:[%s4561_s5 + $0x58] sm:$0xff] }
 0x2e9   :  { %3947 = vmatprep.subr.mxu1 %v45_v16  ;;  %3972 = vmatpush3.msra.mxu0 %v60_v46 }
 0x2ea   :  { %3948 = vmatpush3.msra.mxu1 %v45_v16  ;;  %3973 = vmatprep.subr.mxu0 %v59_v8  ;;  %v53_v16 = vld [vmem:[%s4561_s5 + $0x50] sm:$0xff] }
 0x2eb   :  { %3949 = vmatprep.subr.mxu1 %v44_v51  ;;  %3974 = vmatpush3.msra.mxu0 %v59_v8 }
 0x2ec   :  { %3950 = vmatpush3.msra.mxu1 %v44_v51  ;;  %v51_v51 = vld [vmem:[%s4561_s5 + $0x40] sm:$0xff] }
 0x2ed   :  { %3951 = vmatprep.subr.mxu1 %v43_v52 }
 0x2ee   :  { %3952 = vmatpush3.msra.mxu1 %v43_v52  ;;  %v50_v52 = vld [vmem:[%s4561_s5 + $0x38] sm:$0xff] }
 0x2ef   :  { %3956 = vmatprep.subr.mxu1 %v66_v32 }
 0x38a   :  { %v2612_v14 = vpop.f32.mrf.mxu0 }
 0x38c   :  { %v3909_v47 = vpop.f32.mrf.mxu0 }
 0x38d   :  { %v57_v47 = vld [vmem:[%s4561_s5 + $0x70] sm:$0xff] }
 0x38e   :  { %v2758_v48 = vpop.f32.mrf.mxu0 }
 0x38f   :  { %3129 = vrot.lane.b32.xlu0 %v2758_v48, %s4086_s4  ;;  %v56_v48 = vld [vmem:[%s4561_s5 + $0x68] sm:$0xff] }
 0x390   :  { %v3919_v49 = vpop.f32.mrf.mxu0 }
 0x391   :  { %v55_v49 = vld [vmem:[%s4561_s5 + $0x60] sm:$0xff] }
 0x39a   :  { %v2685_v2 = vpop.f32.mrf.mxu1 }
 0x39c   :  { %v3914_v53 = vpop.f32.mrf.mxu1 }
 0x39d   :  { %v49_v53 = vld [vmem:[%s4561_s5 + $0x30] sm:$0xff] }
 0x39e   :  { %v2904_v54 = vpop.f32.mrf.mxu0 }
 0x39f   :  { %v2831_v55 = vpop.f32.mrf.mxu1  ;;  %3137 = vrot.lane.b32.xlu1 %v2904_v54, %s4087_s25  ;;  %v48_v54 = vld [vmem:[%s4561_s5 + $0x28] sm:$0xff] }
 0x3a0   :  { %v3929_v56 = vpop.f32.mrf.mxu0 }
 0x3a1   :  { %v3924_v57 = vpop.f32.mrf.mxu1  ;;  %v3629_v56 = vld [vmem:[%s4562_s6 + $0x20] ss:$0 sm:$0xff] }
 0x3a2   :  { %v3050_v58 = vpop.f32.mrf.mxu0 }
 0x3a3   :  { %v2977_v60 = vpop.f32.mrf.mxu1  ;;  %3145 = vrot.lane.b32.xlu0 %v3050_v58, %s4088_s26  ;;  %3131 = vrot.lane.b32.xlu1 %v2831_v55, %s4086_s4  ;;  %v47_v55 = vld [vmem:[%s4561_s5 + $0x20] sm:$0xff] }
 0x3a4   :  { %v3939_v61 = vpop.f32.mrf.mxu0 }
 0x3a5   :  { %v3934_v62 = vpop.f32.mrf.mxu1 }
 0x3a7   :  { %v3123_v63 = vpop.f32.mrf.mxu1  ;;  %3139 = vrot.lane.b32.xlu1 %v2977_v60, %s4087_s25  ;;  %s3538_s25 = sshll.u32 %s4090_s24, 4  ;;  %s3539_s25 = int_to_ptr.vmem [resolvable:$true] %s3538_s25 }
 0x3a8   :  { %p4067_p1 = scmp.lt.s32.totalorder %s3539_s25, %s3539_s25 }
 0x3a9   :  { %v3944_v0 = vpop.f32.mrf.mxu1 }
 0x3aa   :  { %v4089_v0 = vmov 1.0  }
 0x3ab   :  { %3147 = vrot.lane.b32.xlu1 %v3123_v63, %s4088_s26  ;;  %s4062_s26 = scalar_lea.vmem %s3539_s25, 256 }
 0x3ac   :  { %p4063_p0 = scmp.ne.s32.totalorder %s3539_s25, %s4062_s26  ;;  %p4068_p2 = scmp.lt.s32.totalorder %s4062_s26, %s4062_s26 }
 0x3ae   :  { %p4069_p3 = por %p4068_p2, %p4067_p1 }
 0x3b0   :  { %p4070_p4 = pnand %p4069_p3, %p4063_p0 }
 0x401   :  { %v3130_v1 = vpop.permute.xlu0 %3129 }
 0x402   :  { %v3151_v7 = vsel %vm1846_vm2, %v2612_v14, %v3130_v1  ;;  %v58_v14 = vld [vmem:[%s4561_s5 + $0x78] sm:$0xff] }
 0x403   :  { %3975 = vmatprep.subr.mxu0 %v58_v14 }
 0x404   :  { %3976 = vmatpush3.msra.mxu0 %v58_v14 }
 0x405   :  { %3977 = vmatprep.subr.mxu0 %v57_v47 }
 0x406   :  { %3978 = vmatpush3.msra.mxu0 %v57_v47 }
 0x407   :  { %3979 = vmatprep.subr.mxu0 %v56_v48 }
 0x408   :  { %3980 = vmatpush3.msra.mxu0 %v56_v48 }
 0x409   :  { %3981 = vmatprep.subr.mxu0 %v55_v49 }
 0x40a   :  { %3982 = vmatpush3.msra.mxu0 %v55_v49 }
 0x40b   :  { %3983 = vmatprep.subr.mxu0 %v54_v50 }
 0x40c   :  { %3984 = vmatpush3.msra.mxu0 %v54_v50 }
 0x40d   :  { %3985 = vmatprep.subr.mxu0 %v53_v16 }
 0x40e   :  { %3986 = vmatpush3.msra.mxu0 %v53_v16 }
 0x411   :  { %v3138_v4 = vpop.permute.xlu1 %3137 }
 0x412   :  { %v3154_v9 = vsel %vm3153_vm3, %v3151_v7, %v3138_v4 }
 0x415   :  { %v3146_v10 = vpop.permute.xlu0 %3145  ;;  %v3132_v11 = vpop.permute.xlu1 %3131 }
 0x416   :  { %v3157_v13 = vsel %vm3156_vm4, %v3154_v9, %v3146_v10  ;;  %v3152_v17 = vsel %vm1846_vm2, %v2685_v2, %v3132_v11  ;;  %v52_v2 = vld [vmem:[%s4561_s5 + $0x48] sm:$0xff] }
 0x417   :  { %3953 = vmatprep.mubr.msk.f32.mxu1 %vm79_vm0, %v3157_v13  ;;  %3987 = vmatprep.subr.mxu0 %v52_v2 }
 0x418   :  { %3988 = vmatpush3.msra.mxu0 %v52_v2  ;;  %v3632_v2 = vld [vmem:[%s4562_s6 + $0x23] ss:$0 sm:$0xff] }
 0x419   :  { %v3140_v15 = vpop.permute.xlu1 %3139  ;;  %3989 = vmatprep.subr.mxu0 %v51_v51 }
 0x41a   :  { %v3155_v18 = vsel %vm3153_vm3, %v3152_v17, %v3140_v15  ;;  %3990 = vmatpush3.msra.mxu0 %v51_v51 }
 0x41b   :  { %3991 = vmatprep.subr.mxu0 %v50_v52 }
 0x41c   :  { %3992 = vmatpush3.msra.mxu0 %v50_v52 }
 0x41d   :  { %v3148_v19 = vpop.permute.xlu1 %3147  ;;  %3993 = vmatprep.subr.mxu0 %v49_v53 }
 0x41e   :  { %v3158_v20 = vsel %vm3156_vm4, %v3155_v18, %v3148_v19  ;;  %3994 = vmatpush3.msra.mxu0 %v49_v53 }
 0x41f   :  { %3954 = vmatmul.mubr.msk.f32.vlgmr.msra.gmra.mxu1 %vm79_vm0, %v3158_v20  ;;  %3995 = vmatprep.subr.mxu0 %v48_v54 }
 0x420   :  { %3957 = vmatpush3.msra.mxu1 %v66_v32  ;;  %3996 = vmatpush3.msra.mxu0 %v48_v54 }
 0x421   :  { %3958 = vmatprep.subr.mxu1 %v65_v33  ;;  %3997 = vmatprep.subr.mxu0 %v47_v55 }
 0x422   :  { %3959 = vmatpush3.msra.mxu1 %v65_v33  ;;  %3998 = vmatpush3.msra.mxu0 %v47_v55 }
 0x4df   :  { %v3955_v22 = vpop.f32.mrf.mxu1 }
 0x4e0   :  { %v3241_v23 = vadd.f32 %v3955_v22, %v3625_v21 }
 0x4e1   :  { %v3235_v24 = vpop.f32.mrf.mxu1 }
 0x4e2   :  { %v3245_v25 = vadd.f32 %v3241_v23, %v4165_v5  ;;  %v3236_v26 = vadd.f32 %v3625_v21, %v3235_v24  ;;  %v63_v5 = vld [vmem:[%s4562_s6] sm:$0xff] }
 0x4e4   :  { %v3244_v27 = vadd.f32 %v3236_v26, %v4145_v3  ;;  %v3247_v28 = vmul.f32 %v3245_v25, %v3245_v25  ;;  %v64_v3 = vld [vmem:[%s4562_s6 + $0x8] sm:$0xff] }
 0x4e5   :  { %3960 = vmatprep.subr.mxu1 %v64_v3 }
 0x4e6   :  { %v3251_v29 = vsel %vm79_vm0, %v3247_v28, 0.0  ;;  %v3246_v30 = vmul.f32 %v3244_v27, %v3244_v27  ;;  %3961 = vmatpush3.msra.mxu1 %v64_v3 }
 0x4e7   :  { %3252 = vadd.xlane.f32.xlu1 %v3251_v29  ;;  %3962 = vmatprep.subr.mxu1 %v63_v5 }
 0x4e8   :  { %v3248_v31 = vsel %vm79_vm0, %v3246_v30, 0.0  ;;  %3963 = vmatpush3.msra.mxu1 %v63_v5 }
 0x4e9   :  { %3249 = vadd.xlane.f32.xlu0 %v3248_v31 }
 0x570   :  { %v3253_v34 = vpop.xlane.xlu1 %3252 }
 0x571   :  { %v3256_v35 = vmul.f32 0.03125, %v3253_v34 }
 0x572   :  { %v3250_v59 = vpop.xlane.xlu0 %3249 }
 0x573   :  { %v3258_v36 = vadd.f32 1e-06, %v3256_v35  ;;  %v3255_v37 = vmul.f32 0.03125, %v3250_v59 }
 0x575   :  { %4042 = vrsqrt.f32 %v3258_v36  ;;  %v3257_v38 = vadd.f32 1e-06, %v3255_v37 }
 0x577   :  { %4044 = vrsqrt.f32 %v3257_v38 }
 0x582   :  { %v4043_v39 = vpop.eup %4042 }
 0x583   :  { %v3262_v6 = vmul.f32 %v4043_v39, %v3245_v25 }
 0x584   :  { %v4045_v40 = vpop.eup %4044 }
 0x585   :  { %v3261_v42 = vmul.f32 %v4045_v40, %v3244_v27  ;;  %v4478_v44 = vmul.f32 %v3628_v41, %v3262_v6 }
 0x587   :  { %v4476_v43 = vmul.f32 %v3628_v41, %v3261_v42 }
 0x589   :  { %3964 = vmatprep.mubr.msk.f32.mxu1 %vm79_vm0, %v4476_v43 }
 0x58a   :  { %3965 = vmatmul.mubr.msk.f32.vlgmr.msra.gmra.mxu1 %vm79_vm0, %v4478_v44 }
 0x64a   :  { %v3966_v57 = vpop.f32.mrf.mxu1 }
 0x64b   :  { %v3351_v58 = vadd.f32 %v3966_v57, %v3629_v56 }
 0x64c   :  { %v3345_v60 = vpop.f32.mrf.mxu1 }
 0x64d   :  { %v3357_v61 = vmul.f32 0.70710677, %v3351_v58  ;;  %v3346_v62 = vadd.f32 %v3629_v56, %v3345_v60  ;;  %v3355_v49 = vmul.f32 0.5, %v3351_v58 }
 0x64f   :  { %vm3359_vm5 = vcmp.lt.f32.partialorder %v3357_v61, 0.0  ;;  %v3356_v63 = vmul.f32 0.70710677, %v3346_v62  ;;  %v3354_v47 = vmul.f32 0.5, %v3346_v62 }
 0x650   :  { %v3361_v1 = vsel %vm3359_vm5, -1.0, %v4089_v0 }
 0x651   :  { %v3363_v4 = vmul.f32 %v3361_v1, %v3357_v61  ;;  %vm3358_vm6 = vcmp.lt.f32.partialorder %v3356_v63, 0.0 }
 0x652   :  { %v3360_v7 = vsel %vm3358_vm6, -1.0, %v4089_v0 }
 0x653   :  { %v3365_v9 = vmul.f32 0.3275911, %v3363_v4  ;;  %v3362_v10 = vmul.f32 %v3360_v7, %v3356_v63  ;;  %v3389_v17 = vsub.f32 0.0, %v3363_v4 }
 0x655   :  { %v3367_v11 = vadd.f32 1.0, %v3365_v9  ;;  %v3364_v13 = vmul.f32 0.3275911, %v3362_v10  ;;  %v3388_v18 = vsub.f32 0.0, %v3362_v10  ;;  %v3391_v19 = vmul.f32 %v3389_v17, %v3363_v4 }
 0x657   :  { %4046 = vrcp.f32 %v3367_v11  ;;  %v3366_v15 = vadd.f32 1.0, %v3364_v13  ;;  %v3390_v21 = vmul.f32 %v3388_v18, %v3362_v10  ;;  %v3394_v23 = vmul.f32 1.442695, %v3391_v19 }
 0x659   :  { %4048 = vrcp.f32 %v3366_v15  ;;  %v3392_v26 = vmul.f32 1.442695, %v3390_v21 }
 0x65a   :  { %4050 = vpow2.f32 %v3394_v23 }
 0x65b   :  { %4052 = vpow2.f32 %v3392_v26 }
 0x664   :  { %v4047_v20 = vpop.eup %4046 }
 0x665   :  { %v3371_v22 = vmul.f32 1.0614054, %v4047_v20 }
 0x666   :  { %v4049_v24 = vpop.eup %4048 }
 0x667   :  { %v3373_v25 = vadd.f32 -1.4531521, %v3371_v22  ;;  %v3370_v27 = vmul.f32 1.0614054, %v4049_v24  ;;  %v4051_v38 = vpop.eup %4050 }
 0x668   :  { %v4053_v41 = vpop.eup %4052 }
 0x669   :  { %v3375_v28 = vmul.f32 %v4047_v20, %v3373_v25  ;;  %v3372_v29 = vadd.f32 -1.4531521, %v3370_v27 }
 0x66b   :  { %v3377_v30 = vadd.f32 1.4214138, %v3375_v28  ;;  %v3374_v31 = vmul.f32 %v4049_v24, %v3372_v29  ;;  %v3634_v28 = vld [vmem:[%s4562_s6 + $0x25] ss:$0 sm:$0xff] }
 0x66d   :  { %v3379_v32 = vmul.f32 %v4047_v20, %v3377_v30  ;;  %v3376_v33 = vadd.f32 1.4214138, %v3374_v31 }
 0x66f   :  { %v3381_v3 = vadd.f32 -0.28449672, %v3379_v32  ;;  %v3378_v5 = vmul.f32 %v4049_v24, %v3376_v33 }
 0x671   :  { %v3383_v34 = vmul.f32 %v4047_v20, %v3381_v3  ;;  %v3380_v35 = vadd.f32 -0.28449672, %v3378_v5 }
 0x673   :  { %v3385_v59 = vadd.f32 0.2548296, %v3383_v34  ;;  %v3382_v36 = vmul.f32 %v4049_v24, %v3380_v35 }
 0x675   :  { %v3387_v37 = vmul.f32 %v4047_v20, %v3385_v59  ;;  %v3384_v39 = vadd.f32 0.2548296, %v3382_v36 }
 0x677   :  { %v3397_v40 = vmul.f32 %v4051_v38, %v3387_v37  ;;  %v3386_v6 = vmul.f32 %v4049_v24, %v3384_v39 }
 0x679   :  { %v3399_v42 = vsub.f32 1.0, %v3397_v40  ;;  %v3396_v12 = vmul.f32 %v4053_v41, %v3386_v6 }
 0x67b   :  { %v3401_v45 = vmul.f32 %v3399_v42, %v3361_v1  ;;  %v3398_v46 = vsub.f32 1.0, %v3396_v12 }
 0x67d   :  { %v3400_v8 = vmul.f32 %v3398_v46, %v3360_v7  ;;  %v3403_v14 = vadd.f32 1.0, %v3401_v45 }
 0x67f   :  { %v3402_v48 = vadd.f32 1.0, %v3400_v8  ;;  %v3405_v16 = vmul.f32 %v3403_v14, %v3355_v49 }
 0x681   :  { %v3404_v50 = vmul.f32 %v3402_v48, %v3354_v47 }
 0x683   :  { %3999 = vmatprep.mubr.f32.mxu0 %v3404_v50 }
 0x684   :  { %4000 = vmatmul.mubr.f32.vlgmr.msra.gmra.mxu0 %v3405_v16 }
 0x744   :  { %v4001_v51 = vpop.f32.mrf.mxu0 }
 0x745   :  { %v3482_v52 = vadd.f32 %v4001_v51, %v3632_v2 }
 0x746   :  { %v3476_v53 = vpop.f32.mrf.mxu0 }
 0x747   :  { %v3477_v54 = vadd.f32 %v3632_v2, %v3476_v53  ;;  %v3486_v55 = vadd.f32 %v3482_v52, %v4478_v44 }
 0x749   :  { %v3485_v56 = vadd.f32 %v3477_v54, %v4476_v43  ;;  %v3488_v58 = vmul.f32 %v3486_v55, %v3486_v55  ;;  %v3633_v43 = vld [vmem:[%s4562_s6 + $0x24] ss:$0 sm:$0xff] }
 0x74b   :  { %v3487_v57 = vmul.f32 %v3485_v56, %v3485_v56  ;;  %v3492_v61 = vsel %vm79_vm0, %v3488_v58, 0.0 }
 0x74d   :  { %v3489_v60 = vsel %vm79_vm0, %v3487_v57, 0.0 }
 0x74e   :  { %3490 = vadd.xlane.f32.xlu0 %v3489_v60 }
 0x752   :  { %3493 = vadd.xlane.f32.xlu0 %v3492_v61 }
 0x7d7   :  { %v3491_v62 = vpop.xlane.xlu0 %3490 }
 0x7d8   :  { %v3495_v63 = vmul.f32 0.03125, %v3491_v62 }
 0x7da   :  { %v3497_v0 = vadd.f32 1e-06, %v3495_v63 }
 0x7db   :  { %v3494_v1 = vpop.xlane.xlu0 %3493 }
 0x7dc   :  { %4054 = vrsqrt.f32 %v3497_v0  ;;  %v3496_v4 = vmul.f32 0.03125, %v3494_v1 }
 0x7de   :  { %v3498_v7 = vadd.f32 1e-06, %v3496_v4 }
 0x7e0   :  { %4056 = vrsqrt.f32 %v3498_v7 }
 0x7e9   :  { %v4055_v9 = vpop.eup %4054 }
 0x7ea   :  { %v3501_v44 = vmul.f32 %v4055_v9, %v3485_v56 }
 0x7ec   :  { %v3507_v10 = vmul.f32 %v3633_v43, %v3501_v44 }
 0x7ed   :  { %v4057_v11 = vpop.eup %4056 }
 0x7ee   :  { %v3509_v13 = vmul.f32 %v3507_v10, %v3507_v10  ;;  %v3502_v15 = vmul.f32 %v4057_v11, %v3486_v55 }
 0x7f0   :  { %v3511_v17 = vsel %vm79_vm0, %v3509_v13, 0.0  ;;  %v3508_v18 = vmul.f32 %v3633_v43, %v3502_v15 }
 0x7f1   :  { %3512 = vadd.xlane.f32.xlu0 %v3511_v17 }
 0x7f2   :  { %v3510_v19 = vmul.f32 %v3508_v18, %v3508_v18 }
 0x7f4   :  { %v3514_v20 = vsel %vm79_vm0, %v3510_v19, 0.0 }
 0x7f5   :  { %3515 = vadd.xlane.f32.xlu1 %v3514_v20 }
 0x87a   :  { %v3513_v21 = vpop.xlane.xlu0 %3512 }
 0x87b   :  { %v3517_v22 = vmul.f32 0.03125, %v3513_v21 }
 0x87d   :  { %v3519_v23 = vadd.f32 1e-06, %v3517_v22 }
 0x87e   :  { %v3516_v24 = vpop.xlane.xlu1 %3515 }
 0x87f   :  { %4058 = vrsqrt.f32 %v3519_v23  ;;  %v3518_v25 = vmul.f32 0.03125, %v3516_v24 }
 0x881   :  { %v3520_v26 = vadd.f32 1e-06, %v3518_v25 }
 0x883   :  { %4060 = vrsqrt.f32 %v3520_v26 }
 0x88c   :  { %v4059_v27 = vpop.eup %4058 }
 0x88d   :  { %v3523_v29 = vmul.f32 %v4059_v27, %v3507_v10 }
 0x88f   :  { %v3529_v30 = vmul.f32 %v3634_v28, %v3523_v29 }
 0x890   :  { %v4061_v31 = vpop.eup %4060 }
 0x891   :  { %v3524_v32 = vmul.f32 %v4061_v31, %v3508_v18  ;;  %3531 = vst.msk [vmem:[#allocation2] sm:$0xff] %vm79_vm0, %v3529_v30 }
 0x893   :  { %v3530_v33 = vmul.f32 %v3634_v28, %v3524_v32 }
 0x895   :  { %3532 = vst.msk [vmem:[#allocation2 + $0x8] sm:$0xff] %vm79_vm0, %v3530_v33 }
 0x896   :  { %4073 = shalt.err (!%p4070_p4)
}
 0x897   :  { %s4091_s6 = smov 128  }
 0x898   :  { %3544 = dma.vmem_to_hbm [thread:$0]  %s3539_s25, 256, %s4563_s7, [#allocation3], %s4091_s6, %s4091_s6, %s4086_s4  }
 0x899   :  { %4082 = dma.done.wait [#allocation3], 256  }
 0x89a   :  { %4083 = vsyncadd [#allocation3], 4294967040 }
 0x89b   :  { %3548 = vsyncpa [#allocation3], 1 }

</bundles_post_ra>
